<compile_context>
chip_gen: v6e
topology: v6e:2x2x1
jax: 0.10.0
libtpu: 0.0.40
codegen_flags: <defaults>
</compile_context>

<pallas_src>
import jax
import jax.numpy as jnp
from jax import lax
from jax.experimental import pallas as pl
from jax.experimental.pallas import tpu as pltpu

_TINY_NORMAL = 1.17549435e-38  # smallest normal f32: keeps packed keys out of denormal range


def _round_up(x, k):
    return (x + k - 1) // k * k


def _pick_tile(n, m_for_budget):
    """Lane tile for the n axis: multiple of 128, <= 512, dividing the padded n, and small
    enough that the ~6 live (m, tile) f32 temporaries stay well inside the default scoped
    VMEM budget on every TPU generation (16 MiB on v5e, 32 MiB on v6e/v7x)."""
    n128 = _round_up(max(n, 1), 128)
    budget = 10 * 1024 * 1024
    for cand in (512, 384, 256, 128):
        if n128 % cand:
            continue
        if cand == 128 or 6 * max(m_for_budget, 1) * cand * 4 <= budget:
            return cand, n128
    return 128, n128


def _make_fp_kernel(num_layers, has_fea1, interpolate, bcast_interp, eps, idx_bits):
    """Fused three_nn + three_interpolate + concat + shared-MLP kernel for one (batch, n-tile)."""
    mask = (1 << idx_bits) - 1
    notmask = ~mask                                   # keeps the (rounded) distance bits
    f32 = jnp.float32

    def kernel(*refs):
        refs = list(refs)
        out_ref = refs[-1]
        i = 0
        nt = out_ref.shape[-1]

        if interpolate:
            p1_ref = refs[i]; i += 1                  # (8, Nt)  query coords (3 padded to 8)
            p2_ref = refs[i]; i += 1                  # (m, 8)   known coords (3 padded to 8)
            fea2_ref = refs[i]; i += 1                # (C2, m)

            p1 = p1_ref[...].astype(f32)
            p2 = p2_ref[...].astype(f32)
            m = p2.shape[0]

            # Pairwise squared distances on the MXU: d[j,i] = |p2_j|^2 + |p1_i|^2 - 2<p2_j,p1_i>.
            cross = jnp.dot(p2, p1, preferred_element_type=f32)          # (m, Nt)  MXU
            n2 = jnp.sum(p2 * p2, axis=1, keepdims=True)                 # (m, 1)
            n1 = jnp.sum(p1 * p1, axis=0, keepdims=True)                 # (1, Nt)
            d = jnp.maximum(n2 + n1 - 2.0 * cross, _TINY_NORMAL)         # (m, Nt), normal & > 0

            # Bit-packed argmin key: row index in the low mantissa bits of the positive f32
            # distance (bit pattern order == value order for positive normals), so a single
            # min per top-3 iteration yields both dmin and the selected row; ties -> lowest row.
            row = lax.broadcasted_iota(jnp.int32, (m, nt), 0)
            key = pltpu.bitcast((pltpu.bitcast(d, jnp.int32) & notmask) | row, f32)

            w_unnorm = jnp.zeros((m, nt), f32)
            recip_sum = jnp.zeros((1, nt), f32)
            for _ in range(3):
                kmin = jnp.min(key, axis=0, keepdims=True)               # (1, Nt)
                onehot = key == kmin                                     # exactly one True / col
                dmin = pltpu.bitcast(pltpu.bitcast(kmin, jnp.int32) & notmask, f32)
                r = pl.reciprocal(dmin + eps, approx=True)               # EUP
                w_unnorm = w_unnorm + jnp.where(onehot, r, 0.0)
                recip_sum = recip_sum + r
                key = jnp.where(onehot, jnp.inf, key)                    # remove selected row

            # three_interpolate as one MXU matmul, then per-point normalization.
            interp = jnp.dot(fea2_ref[...].astype(f32), w_unnorm,
                             preferred_element_type=f32)                 # (C2, Nt)
            interp = interp * pl.reciprocal(recip_sum, approx=True)
        else:
            interp_ref = refs[i]; i += 1                                 # (C2, Nt) or (C2, 1)
            interp = interp_ref[...].astype(f32)
            if bcast_interp:
                interp = jnp.broadcast_to(interp, (interp.shape[0], nt))

        fea1_val = None
        if has_fea1:
            fea1_ref = refs[i]; i += 1                                   # (C1, Nt)
            fea1_val = fea1_ref[...].astype(f32)

        # Layer 0: weight pre-split in the wrapper -> the channel concat never materializes.
        w0a_ref = refs[i]; i += 1
        h = jnp.dot(w0a_ref[...].astype(f32), interp, preferred_element_type=f32)
        if has_fea1:
            w0b_ref = refs[i]; i += 1
            h = h + jnp.dot(w0b_ref[...].astype(f32), fea1_val,
                            preferred_element_type=f32)
        b0_ref = refs[i]; i += 1
        h = jnp.maximum(h + b0_ref[...].astype(f32), 0.0)

        # Remaining 1x1-conv + ReLU layers.
        for _ in range(1, num_layers):
            w_ref = refs[i]; i += 1
            b_ref = refs[i]; i += 1
            h = jnp.dot(w_ref[...].astype(f32), h, preferred_element_type=f32)
            h = jnp.maximum(h + b_ref[...].astype(f32), 0.0)

        out_ref[...] = h.astype(out_ref.dtype)

    return kernel


def pointnet_fp_forward(pts1, pts2, fea1, fea2, mlp_weights, mlp_biases, *,
                        eps=1e-8, out_dtype=None):
    """Pallas forward pass of PointNetFPModule.

    pts1: (B, n, 3); pts2: (B, m, 3) or None; fea1: (B, C1, n) or None; fea2: (B, C2, m)
    mlp_weights: list of (C_out, C_in) 1x1-conv kernels; mlp_biases: list of (C_out,)
    returns: (B, mlp_weights[-1].shape[0], n)
    """
    B, n, _ = pts1.shape
    has_fea1 = fea1 is not None
    interpolate = pts2 is not None
    num_layers = len(mlp_weights)
    assert num_layers >= 1 and num_layers == len(mlp_biases)

    C2 = fea2.shape[1]
    C1 = fea1.shape[1] if has_fea1 else 0
    assert mlp_weights[0].shape[1] == C1 + C2

    if out_dtype is None:
        out_dtype = jnp.result_type(fea2.dtype, mlp_weights[0].dtype)

    m = pts2.shape[1] if interpolate else 0
    if interpolate:
        assert 3 <= m < (1 << 23), "three_nn needs >=3 known points (and m < 2^23)"
    idx_bits = max((m - 1).bit_length(), 1) if interpolate else 1

    tile_n, n_pad = _pick_tile(n, m if interpolate else 1)
    n_tiles = n_pad // tile_n
    pad_n = n_pad - n

    inputs, in_specs = [], []
    bcast_interp = False

    if interpolate:
        # Lane-dense query coords (coordinate dim zero-padded 3 -> 8 so the MXU cross-term
        # contraction is sublane-aligned); pts2 likewise padded to (m, 8).
        pts1t = jnp.transpose(pts1, (0, 2, 1))                           # (B, 3, n)
        pts1t = jnp.pad(pts1t, ((0, 0), (0, 5), (0, pad_n)))             # (B, 8, n_pad)
        pts2p = jnp.pad(pts2, ((0, 0), (0, 0), (0, 5)))                  # (B, m, 8)
        inputs += [pts1t, pts2p, fea2]
        in_specs += [
            pl.BlockSpec((None, 8, tile_n), lambda b, t: (b, 0, t)),
            pl.BlockSpec((None, m, 8), lambda b, t: (b, 0, 0)),
            pl.BlockSpec((None, C2, m), lambda b, t: (b, 0, 0)),
        ]
    else:
        # torch: fea2.expand(B, C2, n); broadcast on lanes inside the kernel instead of
        # materializing a (B, C2, n) array through HBM.
        m2 = fea2.shape[2]
        if m2 == n:
            f2 = jnp.pad(fea2, ((0, 0), (0, 0), (0, pad_n))) if pad_n else fea2
            inputs += [f2]
            in_specs += [pl.BlockSpec((None, C2, tile_n), lambda b, t: (b, 0, t))]
        else:
            assert m2 == 1, "fea2 spatial dim must be 1 or n when pts2 is None"
            inputs += [fea2]
            in_specs += [pl.BlockSpec((None, C2, 1), lambda b, t: (b, 0, 0))]
            bcast_interp = True

    if has_fea1:
        fea1_p = jnp.pad(fea1, ((0, 0), (0, 0), (0, pad_n))) if pad_n else fea1
        inputs += [fea1_p]
        in_specs += [pl.BlockSpec((None, C1, tile_n), lambda b, t: (b, 0, t))]

    # First-layer weight split so the channel concat never materializes.
    w0 = mlp_weights[0]
    if has_fea1:
        params = [w0[:, :C2], w0[:, C2:], mlp_biases[0].reshape(-1, 1)]
    else:
        params = [w0, mlp_biases[0].reshape(-1, 1)]
    for l in range(1, num_layers):
        params += [mlp_weights[l], mlp_biases[l].reshape(-1, 1)]

    def _const_spec(arr):
        nd = arr.ndim
        return pl.BlockSpec(arr.shape, lambda b, t, _nd=nd: (0,) * _nd)

    inputs += params
    in_specs += [_const_spec(p) for p in params]

    c_out = mlp_weights[-1].shape[0]
    c_mid = max(w.shape[0] for w in mlp_weights)

    # VMEM budget estimate (double-buffered blocks + in-kernel (m, tile) temps).  Only raise
    # the scoped limit when needed, never above a cap that is safe on v7x (64 MiB physical).
    est = 2 * 4 * (8 * tile_n + m * 8 + C2 * m + C1 * tile_n + c_out * tile_n)
    est += 4 * (6 * max(m, 1) * tile_n + 2 * c_mid * tile_n)
    cp = dict(dimension_semantics=("parallel", "parallel"))
    if est > (12 << 20):
        cp["vmem_limit_bytes"] = int(min(max(32 << 20, 2 * est), 48 << 20))

    kernel = _make_fp_kernel(num_layers, has_fea1, interpolate, bcast_interp, eps, idx_bits)

    out = pl.pallas_call(
        kernel,
        out_shape=jax.ShapeDtypeStruct((B, c_out, n_pad), out_dtype),
        grid=(B, n_tiles),
        in_specs=in_specs,
        out_specs=pl.BlockSpec((None, c_out, tile_n), lambda b, t: (b, 0, t)),
        compiler_params=pltpu.CompilerParams(**cp),
    )(*inputs)

    if pad_n:
        out = out[:, :, :n]
    return out


def _reference(pts1, pts2, fea1, fea2, weights, biases, eps=1e-8):
    """Pure-JAX reference (three_nn with squared distances, as in the original PointNet++ op)."""
    B, n, _ = pts1.shape
    C2 = fea2.shape[1]
    m = pts2.shape[1]
    diff = pts1[:, :, None, :] - pts2[:, None, :, :]                     # (B, n, m, 3)
    d = jnp.sum(diff * diff, axis=-1)                                    # (B, n, m)
    neg_top, idx = lax.top_k(-d, 3)                                      # (B, n, 3)
    dist3 = -neg_top
    recip = 1.0 / (dist3 + eps)
    w = recip / jnp.sum(recip, axis=-1, keepdims=True)                   # (B, n, 3)
    idx_b = jnp.broadcast_to(idx[:, None, :, :], (B, C2, n, 3))
    fea2_b = jnp.broadcast_to(fea2[:, :, None, :], (B, C2, n, m))
    gathered = jnp.take_along_axis(fea2_b, idx_b, axis=-1)               # (B, C2, n, 3)
    interp = jnp.sum(gathered * w[:, None, :, :], axis=-1)               # (B, C2, n)
    h = jnp.concatenate([interp, fea1], axis=1) if fea1 is not None else interp
    for wgt, b in zip(weights, biases):
        h = jnp.einsum("oc,bcn->bon", wgt, h) + b[None, :, None]
        h = jnp.maximum(h, 0.0)
    return h


if __name__ == "__main__":
    key = jax.random.PRNGKey(0)
    ks = jax.random.split(key, 6)

    B, n, m = 2, 640, 64          # n > m; n not a multiple of 512 -> exercises n-tiling
    C1, C2 = 16, 32
    mlp = [64, 32]

    pts1 = jax.random.normal(ks[0], (B, n, 3), jnp.float32)
    pts2 = jax.random.normal(ks[1], (B, m, 3), jnp.float32)
    fea1 = jax.random.normal(ks[2], (B, C1, n), jnp.float32)
    fea2 = jax.random.normal(ks[3], (B, C2, m), jnp.float32)

    dims = [C1 + C2] + mlp
    weights, biases = [], []
    for i in range(len(mlp)):
        kw = jax.random.fold_in(ks[4], i)
        kb = jax.random.fold_in(ks[5], i)
        weights.append(jax.random.normal(kw, (dims[i + 1], dims[i]), jnp.float32)
                       * (1.0 / (dims[i] ** 0.5)))
        biases.append(0.1 * jax.random.normal(kb, (dims[i + 1],), jnp.float32))

    out = pointnet_fp_forward(pts1, pts2, fea1, fea2, weights, biases)
    out = jax.block_until_ready(out)
    assert out.shape == (B, mlp[-1], n), out.shape

    ref = _reference(pts1, pts2, fea1, fea2, weights, biases)
    max_err = float(jnp.max(jnp.abs(out - ref)))
    assert jnp.allclose(out, ref, rtol=5e-2, atol=5e-2), f"mismatch vs reference, max_err={max_err}"

    print("KERNEL_OK")
</pallas_src>

<mosaic_0001>
module attributes {stable_mosaic.version = 11 : i64} {
  func.func @kernel(%arg0: i32, %arg1: i32, %arg2: memref<1x8x128xf32, #tpu.memory_space<vmem>>, %arg3: memref<1x64x8xf32, #tpu.memory_space<vmem>>, %arg4: memref<1x32x64xf32, #tpu.memory_space<vmem>>, %arg5: memref<1x16x128xf32, #tpu.memory_space<vmem>>, %arg6: memref<64x32xf32, #tpu.memory_space<vmem>>, %arg7: memref<64x16xf32, #tpu.memory_space<vmem>>, %arg8: memref<64x1xf32, #tpu.memory_space<vmem>>, %arg9: memref<32x64xf32, #tpu.memory_space<vmem>>, %arg10: memref<32x1xf32, #tpu.memory_space<vmem>>, %arg11: memref<1x32x128xf32, #tpu.memory_space<vmem>>) attributes {dimension_semantics = [#tpu.dimension_semantics<parallel>, #tpu.dimension_semantics<parallel>], iteration_bounds = array<i64: 2, 5>, scalar_prefetch = 0 : i64, scratch_operands = 0 : i64, tpu.core_type = #tpu.core_type<tc>, window_params = [{transform_indices = @transform_0, window_bounds = array<i64: 1, 8, 128>}, {transform_indices = @transform_1, window_bounds = array<i64: 1, 64, 8>}, {transform_indices = @transform_2, window_bounds = array<i64: 1, 32, 64>}, {transform_indices = @transform_3, window_bounds = array<i64: 1, 16, 128>}, {pipeline_mode = #tpu.pipeline_mode<synchronous>, transform_indices = @transform_4, window_bounds = array<i64: 64, 32>}, {pipeline_mode = #tpu.pipeline_mode<synchronous>, transform_indices = @transform_5, window_bounds = array<i64: 64, 16>}, {pipeline_mode = #tpu.pipeline_mode<synchronous>, transform_indices = @transform_6, window_bounds = array<i64: 64, 1>}, {pipeline_mode = #tpu.pipeline_mode<synchronous>, transform_indices = @transform_7, window_bounds = array<i64: 32, 64>}, {pipeline_mode = #tpu.pipeline_mode<synchronous>, transform_indices = @transform_8, window_bounds = array<i64: 32, 1>}, {transform_indices = @transform_9, window_bounds = array<i64: 1, 32, 128>}]} {
    %c0 = arith.constant 0 : index
    %c0_0 = arith.constant 0 : index
    %c0_1 = arith.constant 0 : index
    %0 = vector.load %arg2[%c0, %c0_0, %c0_1] : memref<1x8x128xf32, #tpu.memory_space<vmem>>, vector<1x8x128xf32>
    %1 = vector.shape_cast %0 : vector<1x8x128xf32> to vector<8x128xf32>
    %c0_2 = arith.constant 0 : index
    %c0_3 = arith.constant 0 : index
    %c0_4 = arith.constant 0 : index
    %2 = vector.load %arg3[%c0_2, %c0_3, %c0_4] : memref<1x64x8xf32, #tpu.memory_space<vmem>>, vector<1x64x8xf32>
    %3 = vector.shape_cast %2 : vector<1x64x8xf32> to vector<64x8xf32>
    %cst = arith.constant dense<0.000000e+00> : vector<64x128xf32>
    %4 = tpu.matmul %3, %1, %cst {dimension_numbers = #tpu.dot_dimension_numbers<[1], [0], [0], [1], [0, 0, 1, 1], [], []>} : vector<64x8xf32>, vector<8x128xf32>, vector<64x128xf32> -> vector<64x128xf32>
    %5 = arith.mulf %3, %3 : vector<64x8xf32>
    %cst_5 = arith.constant dense<0.000000e+00> : vector<64xf32>
    %6 = vector.multi_reduction <add>, %5, %cst_5 [1] : vector<64x8xf32> to vector<64xf32>
    %7 = vector.shape_cast %6 : vector<64xf32> to vector<64x1xf32>
    %8 = arith.mulf %1, %1 : vector<8x128xf32>
    %cst_6 = arith.constant dense<0.000000e+00> : vector<128xf32>
    %9 = vector.multi_reduction <add>, %8, %cst_6 [0] : vector<8x128xf32> to vector<128xf32>
    %10 = vector.shape_cast %9 : vector<128xf32> to vector<1x128xf32>
    %11 = vector.broadcast %7 : vector<64x1xf32> to vector<64x128xf32>
    %12 = vector.broadcast %10 : vector<1x128xf32> to vector<64x128xf32>
    %13 = arith.addf %11, %12 : vector<64x128xf32>
    %cst_7 = arith.constant 2.000000e+00 : f32
    %14 = vector.broadcast %cst_7 : f32 to vector<64x128xf32>
    %15 = arith.mulf %14, %4 : vector<64x128xf32>
    %16 = arith.subf %13, %15 : vector<64x128xf32>
    %cst_8 = arith.constant 1.17549435E-38 : f32
    %17 = vector.broadcast %cst_8 : f32 to vector<64x128xf32>
    %18 = arith.maximumf %16, %17 : vector<64x128xf32>
    %19 = tpu.iota {dimensions = array<i32: 0>} : vector<64x128xi32>
    %20 = tpu.bitcast %18 : vector<64x128xf32> -> vector<64x128xi32>
    %c-64_i32 = arith.constant -64 : i32
    %21 = vector.broadcast %c-64_i32 : i32 to vector<64x128xi32>
    %22 = arith.andi %20, %21 : vector<64x128xi32>
    %23 = arith.ori %22, %19 : vector<64x128xi32>
    %24 = tpu.bitcast %23 : vector<64x128xi32> -> vector<64x128xf32>
    %cst_9 = arith.constant 0.000000e+00 : f32
    %25 = vector.broadcast %cst_9 : f32 to vector<64x128xf32>
    %cst_10 = arith.constant 0.000000e+00 : f32
    %26 = vector.broadcast %cst_10 : f32 to vector<1x128xf32>
    %cst_11 = arith.constant dense<0x7F800000> : vector<128xf32>
    %27 = vector.multi_reduction <minimumf>, %24, %cst_11 [0] : vector<64x128xf32> to vector<128xf32>
    %28 = vector.shape_cast %27 : vector<128xf32> to vector<1x128xf32>
    %29 = vector.broadcast %28 : vector<1x128xf32> to vector<64x128xf32>
    %30 = arith.cmpf oeq, %24, %29 : vector<64x128xf32>
    %31 = tpu.bitcast %28 : vector<1x128xf32> -> vector<1x128xi32>
    %c-64_i32_12 = arith.constant -64 : i32
    %32 = vector.broadcast %c-64_i32_12 : i32 to vector<1x128xi32>
    %33 = arith.andi %31, %32 : vector<1x128xi32>
    %34 = tpu.bitcast %33 : vector<1x128xi32> -> vector<1x128xf32>
    %cst_13 = arith.constant 9.99999993E-9 : f32
    %35 = vector.broadcast %cst_13 : f32 to vector<1x128xf32>
    %36 = arith.addf %34, %35 : vector<1x128xf32>
    %37 = tpu.reciprocal %36 {approx = true} : vector<1x128xf32> -> vector<1x128xf32>
    %cst_14 = arith.constant 0.000000e+00 : f32
    %38 = vector.shape_cast %37 : vector<1x128xf32> to vector<1x128xf32>
    %39 = vector.broadcast %38 : vector<1x128xf32> to vector<64x128xf32>
    %40 = vector.broadcast %cst_14 : f32 to vector<64x128xf32>
    %41 = arith.select %30, %39, %40 : vector<64x128xi1>, vector<64x128xf32>
    %42 = arith.addf %25, %41 : vector<64x128xf32>
    %43 = arith.addf %26, %37 : vector<1x128xf32>
    %cst_15 = arith.constant 0x7F800000 : f32
    %44 = vector.broadcast %cst_15 : f32 to vector<64x128xf32>
    %45 = arith.select %30, %44, %24 : vector<64x128xi1>, vector<64x128xf32>
    %cst_16 = arith.constant dense<0x7F800000> : vector<128xf32>
    %46 = vector.multi_reduction <minimumf>, %45, %cst_16 [0] : vector<64x128xf32> to vector<128xf32>
    %47 = vector.shape_cast %46 : vector<128xf32> to vector<1x128xf32>
    %48 = vector.broadcast %47 : vector<1x128xf32> to vector<64x128xf32>
    %49 = arith.cmpf oeq, %45, %48 : vector<64x128xf32>
    %50 = tpu.bitcast %47 : vector<1x128xf32> -> vector<1x128xi32>
    %c-64_i32_17 = arith.constant -64 : i32
    %51 = vector.broadcast %c-64_i32_17 : i32 to vector<1x128xi32>
    %52 = arith.andi %50, %51 : vector<1x128xi32>
    %53 = tpu.bitcast %52 : vector<1x128xi32> -> vector<1x128xf32>
    %cst_18 = arith.constant 9.99999993E-9 : f32
    %54 = vector.broadcast %cst_18 : f32 to vector<1x128xf32>
    %55 = arith.addf %53, %54 : vector<1x128xf32>
    %56 = tpu.reciprocal %55 {approx = true} : vector<1x128xf32> -> vector<1x128xf32>
    %cst_19 = arith.constant 0.000000e+00 : f32
    %57 = vector.shape_cast %56 : vector<1x128xf32> to vector<1x128xf32>
    %58 = vector.broadcast %57 : vector<1x128xf32> to vector<64x128xf32>
    %59 = vector.broadcast %cst_19 : f32 to vector<64x128xf32>
    %60 = arith.select %49, %58, %59 : vector<64x128xi1>, vector<64x128xf32>
    %61 = arith.addf %42, %60 : vector<64x128xf32>
    %62 = arith.addf %43, %56 : vector<1x128xf32>
    %cst_20 = arith.constant 0x7F800000 : f32
    %63 = vector.broadcast %cst_20 : f32 to vector<64x128xf32>
    %64 = arith.select %49, %63, %45 : vector<64x128xi1>, vector<64x128xf32>
    %cst_21 = arith.constant dense<0x7F800000> : vector<128xf32>
    %65 = vector.multi_reduction <minimumf>, %64, %cst_21 [0] : vector<64x128xf32> to vector<128xf32>
    %66 = vector.shape_cast %65 : vector<128xf32> to vector<1x128xf32>
    %67 = vector.broadcast %66 : vector<1x128xf32> to vector<64x128xf32>
    %68 = arith.cmpf oeq, %64, %67 : vector<64x128xf32>
    %69 = tpu.bitcast %66 : vector<1x128xf32> -> vector<1x128xi32>
    %c-64_i32_22 = arith.constant -64 : i32
    %70 = vector.broadcast %c-64_i32_22 : i32 to vector<1x128xi32>
    %71 = arith.andi %69, %70 : vector<1x128xi32>
    %72 = tpu.bitcast %71 : vector<1x128xi32> -> vector<1x128xf32>
    %cst_23 = arith.constant 9.99999993E-9 : f32
    %73 = vector.broadcast %cst_23 : f32 to vector<1x128xf32>
    %74 = arith.addf %72, %73 : vector<1x128xf32>
    %75 = tpu.reciprocal %74 {approx = true} : vector<1x128xf32> -> vector<1x128xf32>
    %cst_24 = arith.constant 0.000000e+00 : f32
    %76 = vector.shape_cast %75 : vector<1x128xf32> to vector<1x128xf32>
    %77 = vector.broadcast %76 : vector<1x128xf32> to vector<64x128xf32>
    %78 = vector.broadcast %cst_24 : f32 to vector<64x128xf32>
    %79 = arith.select %68, %77, %78 : vector<64x128xi1>, vector<64x128xf32>
    %80 = arith.addf %61, %79 : vector<64x128xf32>
    %81 = arith.addf %62, %75 : vector<1x128xf32>
    %c0_25 = arith.constant 0 : index
    %c0_26 = arith.constant 0 : index
    %c0_27 = arith.constant 0 : index
    %82 = vector.load %arg4[%c0_25, %c0_26, %c0_27] : memref<1x32x64xf32, #tpu.memory_space<vmem>>, vector<1x32x64xf32>
    %83 = vector.shape_cast %82 : vector<1x32x64xf32> to vector<32x64xf32>
    %cst_28 = arith.constant dense<0.000000e+00> : vector<32x128xf32>
    %84 = tpu.matmul %83, %80, %cst_28 {dimension_numbers = #tpu.dot_dimension_numbers<[1], [0], [0], [1], [0, 0, 1, 1], [], []>} : vector<32x64xf32>, vector<64x128xf32>, vector<32x128xf32> -> vector<32x128xf32>
    %85 = tpu.reciprocal %81 {approx = true} : vector<1x128xf32> -> vector<1x128xf32>
    %86 = vector.broadcast %85 : vector<1x128xf32> to vector<32x128xf32>
    %87 = arith.mulf %84, %86 : vector<32x128xf32>
    %c0_29 = arith.constant 0 : index
    %c0_30 = arith.constant 0 : index
    %c0_31 = arith.constant 0 : index
    %88 = vector.load %arg5[%c0_29, %c0_30, %c0_31] : memref<1x16x128xf32, #tpu.memory_space<vmem>>, vector<1x16x128xf32>
    %89 = vector.shape_cast %88 : vector<1x16x128xf32> to vector<16x128xf32>
    %c0_32 = arith.constant 0 : index
    %c0_33 = arith.constant 0 : index
    %90 = vector.load %arg6[%c0_32, %c0_33] : memref<64x32xf32, #tpu.memory_space<vmem>>, vector<64x32xf32>
    %cst_34 = arith.constant dense<0.000000e+00> : vector<64x128xf32>
    %91 = tpu.matmul %90, %87, %cst_34 {dimension_numbers = #tpu.dot_dimension_numbers<[1], [0], [0], [1], [0, 0, 1, 1], [], []>} : vector<64x32xf32>, vector<32x128xf32>, vector<64x128xf32> -> vector<64x128xf32>
    %c0_35 = arith.constant 0 : index
    %c0_36 = arith.constant 0 : index
    %92 = vector.load %arg7[%c0_35, %c0_36] : memref<64x16xf32, #tpu.memory_space<vmem>>, vector<64x16xf32>
    %cst_37 = arith.constant dense<0.000000e+00> : vector<64x128xf32>
    %93 = tpu.matmul %92, %89, %cst_37 {dimension_numbers = #tpu.dot_dimension_numbers<[1], [0], [0], [1], [0, 0, 1, 1], [], []>} : vector<64x16xf32>, vector<16x128xf32>, vector<64x128xf32> -> vector<64x128xf32>
    %94 = arith.addf %91, %93 : vector<64x128xf32>
    %c0_38 = arith.constant 0 : index
    %c0_39 = arith.constant 0 : index
    %95 = vector.load %arg8[%c0_38, %c0_39] : memref<64x1xf32, #tpu.memory_space<vmem>>, vector<64x1xf32>
    %96 = vector.broadcast %95 : vector<64x1xf32> to vector<64x128xf32>
    %97 = arith.addf %94, %96 : vector<64x128xf32>
    %cst_40 = arith.constant 0.000000e+00 : f32
    %98 = vector.broadcast %cst_40 : f32 to vector<64x128xf32>
    %99 = arith.maximumf %97, %98 : vector<64x128xf32>
    %c0_41 = arith.constant 0 : index
    %c0_42 = arith.constant 0 : index
    %100 = vector.load %arg9[%c0_41, %c0_42] : memref<32x64xf32, #tpu.memory_space<vmem>>, vector<32x64xf32>
    %cst_43 = arith.constant dense<0.000000e+00> : vector<32x128xf32>
    %101 = tpu.matmul %100, %99, %cst_43 {dimension_numbers = #tpu.dot_dimension_numbers<[1], [0], [0], [1], [0, 0, 1, 1], [], []>} : vector<32x64xf32>, vector<64x128xf32>, vector<32x128xf32> -> vector<32x128xf32>
    %c0_44 = arith.constant 0 : index
    %c0_45 = arith.constant 0 : index
    %102 = vector.load %arg10[%c0_44, %c0_45] : memref<32x1xf32, #tpu.memory_space<vmem>>, vector<32x1xf32>
    %103 = vector.broadcast %102 : vector<32x1xf32> to vector<32x128xf32>
    %104 = arith.addf %101, %103 : vector<32x128xf32>
    %cst_46 = arith.constant 0.000000e+00 : f32
    %105 = vector.broadcast %cst_46 : f32 to vector<32x128xf32>
    %106 = arith.maximumf %104, %105 : vector<32x128xf32>
    %c0_47 = arith.constant 0 : index
    %c0_48 = arith.constant 0 : index
    %c0_49 = arith.constant 0 : index
    %107 = vector.load %arg11[%c0_47, %c0_48, %c0_49] : memref<1x32x128xf32, #tpu.memory_space<vmem>>, vector<1x32x128xf32>
    %108 = vector.shape_cast %107 : vector<1x32x128xf32> to vector<32x128xf32>
    %109 = vector.shape_cast %106 : vector<32x128xf32> to vector<1x32x128xf32>
    tpu.vector_store %arg11[%c0_47, %c0_48, %c0_49], %109 {strides = array<i32>} : memref<1x32x128xf32, #tpu.memory_space<vmem>>, vector<1x32x128xf32>,
    return
  }
  func.func @transform_0(%arg0: i32, %arg1: i32) -> (i32, i32, i32) {
    %c0_i32 = arith.constant 0 : i32
    %c0_i32_0 = arith.constant 0 : i32
    return %arg0, %c0_i32, %arg1 : i32, i32, i32
  }
  func.func @transform_1(%arg0: i32, %arg1: i32) -> (i32, i32, i32) {
    %c0_i32 = arith.constant 0 : i32
    %c0_i32_0 = arith.constant 0 : i32
    %c0_i32_1 = arith.constant 0 : i32
    return %arg0, %c0_i32, %c0_i32_0 : i32, i32, i32
  }
  func.func @transform_2(%arg0: i32, %arg1: i32) -> (i32, i32, i32) {
    %c0_i32 = arith.constant 0 : i32
    %c0_i32_0 = arith.constant 0 : i32
    %c0_i32_1 = arith.constant 0 : i32
    return %arg0, %c0_i32, %c0_i32_0 : i32, i32, i32
  }
  func.func @transform_3(%arg0: i32, %arg1: i32) -> (i32, i32, i32) {
    %c0_i32 = arith.constant 0 : i32
    %c0_i32_0 = arith.constant 0 : i32
    return %arg0, %c0_i32, %arg1 : i32, i32, i32
  }
  func.func @transform_4(%arg0: i32, %arg1: i32) -> (i32, i32) {
    %c0_i32 = arith.constant 0 : i32
    %c0_i32_0 = arith.constant 0 : i32
    %c0_i32_1 = arith.constant 0 : i32
    return %c0_i32, %c0_i32_0 : i32, i32
  }
  func.func @transform_5(%arg0: i32, %arg1: i32) -> (i32, i32) {
    %c0_i32 = arith.constant 0 : i32
    %c0_i32_0 = arith.constant 0 : i32
    %c0_i32_1 = arith.constant 0 : i32
    return %c0_i32, %c0_i32_0 : i32, i32
  }
  func.func @transform_6(%arg0: i32, %arg1: i32) -> (i32, i32) {
    %c0_i32 = arith.constant 0 : i32
    %c0_i32_0 = arith.constant 0 : i32
    %c0_i32_1 = arith.constant 0 : i32
    return %c0_i32, %c0_i32_0 : i32, i32
  }
  func.func @transform_7(%arg0: i32, %arg1: i32) -> (i32, i32) {
    %c0_i32 = arith.constant 0 : i32
    %c0_i32_0 = arith.constant 0 : i32
    %c0_i32_1 = arith.constant 0 : i32
    return %c0_i32, %c0_i32_0 : i32, i32
  }
  func.func @transform_8(%arg0: i32, %arg1: i32) -> (i32, i32) {
    %c0_i32 = arith.constant 0 : i32
    %c0_i32_0 = arith.constant 0 : i32
    %c0_i32_1 = arith.constant 0 : i32
    return %c0_i32, %c0_i32_0 : i32, i32
  }
  func.func @transform_9(%arg0: i32, %arg1: i32) -> (i32, i32, i32) {
    %c0_i32 = arith.constant 0 : i32
    %c0_i32_0 = arith.constant 0 : i32
    return %arg0, %c0_i32, %arg1 : i32, i32, i32
  }
}

</mosaic_0001>

<bundles_post_ra>
// kernel: tpu_custom_call.1
= control target key start
LH: loop header
LB: loop body
LE: loop exit
PB: predicated region body
PF: predicated region fallthrough
CT: control target
= control target key end

     0   :  { %s2516_s0 = inlined_call_operand.vmem [shape: f32[2,8,640], index: 0, kind: input, shape index: {}]   ;;  %s2517_s1 = inlined_call_operand.vmem [shape: f32[2,64,8], index: 1, kind: input, shape index: {}]   ;;  %s2518_s2 = inlined_call_operand.vmem [shape: f32[2,32,64], index: 2, kind: input, shape index: {}]   ;;  %s2519_s3 = inlined_call_operand.vmem [shape: f32[2,16,640], index: 3, kind: input, shape index: {}]   ;;  %s2520_s4 = inlined_call_operand.vmem [shape: f32[64,32], index: 4, kind: input, shape index: {}]   ;;  %s2521_s5 = inlined_call_operand.vmem [shape: f32[64,16], index: 5, kind: input, shape index: {}]   ;;  %s2522_s6 = inlined_call_operand.vmem [shape: f32[64,1], index: 6, kind: input, shape index: {}]   ;;  %s2523_s7 = inlined_call_operand.vmem [shape: f32[32,64], index: 7, kind: input, shape index: {}]   ;;  %s2524_s8 = inlined_call_operand.vmem [shape: f32[32,1], index: 8, kind: input, shape index: {}]   ;;  %s2525_s9 = inlined_call_operand.hbm [shape: f32[2,32,640], index: 9, kind: output, shape index: {}]  }
   0x1   :  { %2529 = sst [smem:[#allocation9_spill]] %s2519_s3 }
   0x2   :  { %14 = vsyncpa [#allocation4], 0 }
   0x3   :  { %16 = vsyncpa [#allocation4 + $0x1], 0  ;;  %s2015_s30 = smov 0   ;;  %s2017_s10 = smov 0  }
   0x4   :  { %s2019_s11 = smov 0   ;;  %s2021_s12 = smov 0  }
   0x5   :  { %s2023_s13 = smov 0   ;;  %s2025_s14 = smov 0  }
   0x6   :  { %s2027_s15 = smov 0   ;;  %s2029_s16 = smov 0  }
   0x7 LB: > { %s1577_s17 = sadd.s32 4294967295, %s1958_s16   ;;  %s1578_s18 = sadd.s32 4294967294, %s1958_s16   ;;  %s1958_s16 = sphi %s2029_s16, %s22_s16   ;;  %s1954_s15 = sphi %s2027_s15, %s2546_s15   ;;  %s1950_s14 = sphi %s2025_s14, %s2545_s14   ;;  %s1946_s13 = sphi %s2023_s13, %s2544_s13   ;;  %s1942_s12 = sphi %s2021_s12, %s2543_s12   ;;  %s1938_s11 = sphi %s2019_s11, %s2542_s11   ;;  %s1934_s10 = sphi %s2017_s10, %s2541_s10   ;;  %s1930_s30 = sphi %s2015_s30, %s2540_s30  }
   0x8   : > { %s31_s19 = sadd.s32 1, %s1950_s14  ;;  %s34_s20 = sadd.s32 1, %s1954_s15 }
   0x9   : > { %p32_p0 = scmp.ge.s32.totalorder %s31_s19, 5  ;;  %p130_p1 = scmp.ne.s32.totalorder %s1938_s11, %s1934_s10 }
   0xa   : > { %p131_p2 = scmp.eq.s32.totalorder %s1958_s16, 0  ;;  %p267_p5 = scmp.eq.s32.totalorder %s1577_s17, 9 }
   0xb   : > { %s2548_s19 = smov (%p32_p0, %s31_s19), 0  ;;  %s2550_s20 = smov (!%p32_p0, %s34_s20), %s1954_s15 }
   0xc   : > { %2530 = sst [smem:[#allocation6_spill]] %s2548_s19  ;;  %s119_s21 = ssub.s32 %s1950_s14, %s2548_s19 }
   0xd   : > { %p2067_p3 = por %p131_p2, %p130_p1  ;;  %p36_p4 = scmp.ge.s32.totalorder %s2550_s20, 2 }
   0xe   : > { %p272_p6 = scmp.ne.s32.totalorder %s1934_s10, %s1930_s30  ;;  %p273_p7 = scmp.eq.s32.totalorder %s1578_s18, 9 }
   0xf   : > { %s2552_s20 = smov (%p36_p4, %s2550_s20), 0  ;;  %p2075_p8 = por %p267_p5, %p130_p1 }
  0x10   : > { %2532 = sst [smem:[#allocation7_spill]] %s2552_s20  ;;  %p2079_p9 = por %p273_p7, %p272_p6 }
  0x11   : > { %s118_s25 = ssub.s32 %s1954_s15, %s2552_s20  ;;  %s123_s27 = sadd.s32 1, %s1938_s11 }
  0x12   : > { %s2534_s24 = scalar_select %p2079_p9, 1, 0 }
  0x13   : > { %s120_s26 = sor.u32 %s119_s21, %s118_s25  ;;  %p1580_p11 = scmp.ge.s32.totalorder %s1958_s16, 10 }
  0x14   : > { %2535 = sst [smem:[#allocation8_spill]] %s2534_s24  ;;  %p121_p10 = scmp.eq.s32.totalorder %s120_s26, 0 }
  0x15   : > { %304 = sbr.rel (%p1580_p11) target bundleno = 37 (0x25), region = 36 }
  0x16   : > { %s2087_s28 = scalar_select %p121_p10, %s1938_s11, %s123_s27  }
  0x1a   : > { %334 = sbr.rel (!%p2067_p3) target bundleno = 37 (0x25), region = 52  ;;  %s336_s29 = sand.u32 (%p2067_p3), 1, %s1938_s11  }
  0x1b   : > { %s1778_s17 = smul.u32 (%p2067_p3), 10, %s1954_s15  ;;  %s1581_s18 = sshll.u32 (%p2067_p3), %s336_s29, 4 }
  0x1c   : > { %s2536_s3 = sld [smem:[#allocation9_spill]] (%p2067_p3)  ;;  %s338_s26 = scalar_lea.vmem (%p2067_p3), [#allocation2], %s1581_s18 }
  0x1d   : > { %s340_s19 = sadd.s32 (%p2067_p3), %s1950_s14, %s1778_s17 }
  0x1e   : > { %s1582_s24 = sshll.u32 (%p2067_p3), %s340_s19, 3 }
  0x22   : > { %s342_s25 = scalar_lea.vmem %s2536_s3, %s1582_s24 }
  0x23   : > { %v373_v0 = vld [vmem:[%s342_s25] sm:$0xff]  ;;  %v375_v1 = vld [vmem:[%s342_s25 + $0x28] sm:$0xff] }
  0x24   : > { %374 = vst [vmem:[%s338_s26] sm:$0xff] %v373_v0  ;;  %376 = vst [vmem:[%s338_s26 + $0x8] sm:$0xff] %v375_v1 }
  0x25 PF: > { %p1583_p12 = scmp.ge.s32.totalorder %s1958_s16, 1  ;;  %p381_p13 = scmp.lt.s32.totalorder %s1958_s16, 11 }
  0x27   : > { %p382_p0 = pnand %p1583_p12, %p381_p13 }
  0x28   : > { %p441_p1 = scmp.lt.s32.totalorder (!%p382_p0), %s1946_s13, 1  ;;  %p443_p2 = scmp.lt.s32.totalorder (!%p382_p0), %s1942_s12, 4 }
  0x29   : > { %385 = sbr.rel (%p382_p0) target bundleno = 1026 (0x402), region = 90  ;;  %s2139_s27 = sand.u32 (!%p382_p0), 1, %s1934_s10  }
  0x2e   : > { %s2103_s19 = scalar_select %p441_p1, %s1946_s13, 1  ;;  %vm468_vm0 = vcmask 64512   ;;  %vm859_vm1 = vcmask 523264   ;;  %v669_v46 = vlaneseq }
  0x2f   : > { %s444_s20 = scalar_select %p443_p2, %s1942_s12, 4 }
  0x30   : > { %s1779_s22 = smul.u32 5, %s2103_s19  ;;  %s1627_s24 = sshll.u32 %s2103_s19, 6  ;;  %v670_v59 = vshrl.u32 %v669_v46, 7 }
  0x31   : > { %s453_s17 = scalar_lea.vmem %s2517_s1, %s1627_s24 }
  0x32   : > { %s446_s18 = sadd.s32 %s1779_s22, %s444_s20  ;;  %v460_v2 = vld [vmem:[%s453_s17] sm:$0xff]  ;;  %v461_v3 = vld [vmem:[%s453_s17 + $0x8] sm:$0xff]  ;;  %v462_v4 = vld [vmem:[%s453_s17 + $0x10] sm:$0xff]  ;;  %s1961_s22 = smov [#allocation3]  }
  0x33   : > { %s1586_s21 = sshll.u32 %s446_s18, 3  ;;  %1686 = vmatprep.mubr.msk.f32.mxu0 %vm468_vm0, %v460_v2  ;;  %v598_v5 = vmul.f32 %v460_v2, %v460_v2  ;;  %v463_v6 = vld [vmem:[%s453_s17 + $0x18] sm:$0xff]  ;;  %v600_v7 = vmul.f32 %v462_v4, %v462_v4  ;;  %v599_v8 = vmul.f32 %v461_v3, %v461_v3  ;;  %v464_v13 = vld [vmem:[%s453_s17 + $0x20] sm:$0xff]  ;;  %v465_v14 = vld [vmem:[%s453_s17 + $0x28] sm:$0xff] }
  0x34   : > { %s448_s3 = scalar_lea.vmem %s2516_s0, %s1586_s21  ;;  %v601_v9 = vmul.f32 %v463_v6, %v463_v6  ;;  %v602_v16 = vmul.f32 %v464_v13, %v464_v13  ;;  %v603_v18 = vmul.f32 %v465_v14, %v465_v14  ;;  %v466_v19 = vld [vmem:[%s453_s17 + $0x30] sm:$0xff]  ;;  %v467_v20 = vld [vmem:[%s453_s17 + $0x38] sm:$0xff] }
  0x35   : > { %v459_v10 = vld [vmem:[%s448_s3] sm:$0xff]  ;;  %v606_v11 = vsel %vm468_vm0, %v598_v5, 0.0  ;;  %v612_v12 = vsel %vm468_vm0, %v600_v7, 0.0  ;;  %v609_v15 = vsel %vm468_vm0, %v599_v8, 0.0  ;;  %v604_v22 = vmul.f32 %v466_v19, %v466_v19  ;;  %s1628_s3 = sshll.u32 %s2103_s19, 5  ;;  %s1584_s19 = sshll.u32 %s2139_s27, 4 }
  0x36   : > { %1684 = vmatprep.subr.mxu0 %v459_v10  ;;  %607 = vadd.xlane.f32.xlu0 %v606_v11  ;;  %v615_v17 = vsel %vm468_vm0, %v601_v9, 0.0  ;;  %v618_v21 = vsel %vm468_vm0, %v602_v16, 0.0  ;;  %v621_v23 = vsel %vm468_vm0, %v603_v18, 0.0  ;;  %v605_v24 = vmul.f32 %v467_v20, %v467_v20  ;;  %s2134_s24 = scalar_lea.vmem %s2518_s2, %s1628_s3  ;;  %s2142_s29 = scalar_lea.vmem [#allocation2], %s1584_s19 }
  0x37   : > { %1685 = vmatpush3.msra.mxu0 %v459_v10  ;;  %613 = vadd.xlane.f32.xlu1 %v612_v12  ;;  %v624_v25 = vsel %vm468_vm0, %v604_v22, 0.0  ;;  %v630_v27 = vmul.f32 %v459_v10, %v459_v10  ;;  %v855_v36 = vld [vmem:[%s2134_s24] sm:$0xff]  ;;  %v963_v47 = vld [vmem:[%s2142_s29 + $0x8] sm:$0xff]  ;;  %v671_v8 = vadd.s32 8, %v670_v59  ;;  %v673_v22 = vadd.s32 24, %v670_v59  ;;  %s1585_s19 = sshll.u32 %s2139_s27, 5 }
  0x38   : > { %1687 = vmatmul.mubr.msk.f32.vlgmr.msra.gmra.mxu0 %vm468_vm0, %v461_v3  ;;  %v627_v26 = vsel %vm468_vm0, %v605_v24, 0.0  ;;  %1714 = vmatprep.mubr.msk.f32.mxu1 %vm859_vm1, %v855_v36  ;;  %v677_v24 = vadd.s32 56, %v670_v59  ;;  %s440_s18 = scalar_lea.vmem [#allocation3], %s1585_s19  ;;  %s1438_s3 = scalar_lea.sflag [#allocation4], %s2139_s27 }
  0x39   : > { %1689 = vmatprep.mubr.msk.f32.mxu0 %vm468_vm0, %v462_v4  ;;  %v631_v28 = vrot.slane %v630_v27, 4  ;;  %1720 = vmatprep.subr.mxu0 %v963_v47  ;;  %s1452_s21 = sshll.u32 %s440_s18, 4  ;;  %s2458_s21 = int_to_ptr.vmem [resolvable:$true] %s1452_s21 }
  0x3a   : > { %610 = vadd.xlane.f32.xlu0 %v609_v15  ;;  %1721 = vmatpush3.msra.mxu0 %v963_v47  ;;  %v674_v15 = vadd.s32 32, %v670_v59  ;;  %s1866_s20 = scalar_lea.vmem %s2458_s21, 512 }
  0x3b   : > { %616 = vadd.xlane.f32.xlu1 %v615_v17  ;;  %v632_v29 = vadd.f32 %v631_v28, %v630_v27  ;;  %p1867_p3 = scmp.ne.s32.totalorder %s2458_s21, %s1866_s20 }
  0x3c   : > { %1690 = vmatmul.mubr.msk.f32.gmra.mxu0 %vm468_vm0, %v463_v6 }
  0x3d   : > { %1692 = vmatprep.mubr.msk.f32.mxu0 %vm468_vm0, %v464_v13  ;;  %v633_v30 = vrot.slane %v632_v29, 2  ;;  %p1868_p4 = pnand %p1867_p3, %p2075_p8 }
  0x3e   : > { %619 = vadd.xlane.f32.xlu0 %v618_v21 }
  0x3f   : > { %622 = vadd.xlane.f32.xlu1 %v621_v23  ;;  %v634_v32 = vadd.f32 %v633_v30, %v632_v29  ;;  %v675_v23 = vadd.s32 40, %v670_v59  ;;  %p1869_p5 = pneg %p1868_p4 }
  0x40   : > { %1693 = vmatmul.mubr.msk.f32.gmra.mxu0 %vm468_vm0, %v465_v14 }
  0x41   : > { %1695 = vmatprep.mubr.msk.f32.mxu0 %vm468_vm0, %v466_v19  ;;  %v635_v35 = vrot.slane %v634_v32, 1 }
  0x42   : > { %625 = vadd.xlane.f32.xlu0 %v624_v25 }
  0x43   : > { %628 = vadd.xlane.f32.xlu1 %v627_v26  ;;  %v636_v39 = vadd.f32 %v635_v35, %v634_v32  ;;  %v676_v32 = vadd.s32 48, %v670_v59 }
  0x44   : > { %1696 = vmatmul.mubr.msk.f32.gmra.mxu0 %vm468_vm0, %v467_v20 }
  0xbf   : > { %v608_v33 = vpop.xlane.xlu0 %607 }
  0xc0   : > { %v614_v31 = vpop.xlane.xlu1 %613  ;;  %v637_v42 = vadd.f32 %v636_v39, %v608_v33 }
  0xc1   : > { %v639_v58 = vadd.f32 %v636_v39, %v614_v31  ;;  %v672_v31 = vadd.s32 16, %v670_v59 }
  0xc3   : > { %v611_v37 = vpop.xlane.xlu0 %610 }
  0xc4   : > { %v617_v34 = vpop.xlane.xlu1 %616  ;;  %v638_v48 = vadd.f32 %v636_v39, %v611_v37 }
  0xc5   : > { %v640_v50 = vadd.f32 %v636_v39, %v617_v34 }
  0xc7   : > { %v620_v45 = vpop.xlane.xlu0 %619 }
  0xc8   : > { %v623_v41 = vpop.xlane.xlu1 %622  ;;  %v641_v60 = vadd.f32 %v636_v39, %v620_v45 }
  0xc9   : > { %v642_v55 = vadd.f32 %v636_v39, %v623_v41 }
  0xcb   : > { %v626_v1 = vpop.xlane.xlu0 %625 }
  0xcc   : > { %v629_v57 = vpop.xlane.xlu1 %628  ;;  %v643_v11 = vadd.f32 %v636_v39, %v626_v1 }
  0xcd   : > { %v644_v4 = vadd.f32 %v636_v39, %v629_v57 }
  0xf8   : > { %v1688_v38 = vpop.f32.mrf.mxu0 }
  0xf9   : > { %v646_v49 = vmul.f32 2.0, %v1688_v38 }
  0xfa   : > { %v559_v40 = vpop.f32.mrf.mxu0 }
  0xfb   : > { %v645_v43 = vmul.f32 2.0, %v559_v40  ;;  %v654_v61 = vsub.f32 %v638_v48, %v646_v49 }
  0xfc   : > { %v1691_v44 = vpop.f32.mrf.mxu0 }
  0xfd   : > { %v648_v51 = vmul.f32 2.0, %v1691_v44  ;;  %v653_v54 = vsub.f32 %v637_v42, %v645_v43  ;;  %v662_v12 = vmax.f32 %v654_v61, 1.1754944e-38 }
  0xfe   : > { %v569_v52 = vpop.f32.mrf.mxu0 }
  0xff   : > { %v647_v53 = vmul.f32 2.0, %v569_v52  ;;  %v656_v62 = vsub.f32 %v640_v50, %v648_v51  ;;  %v661_v5 = vmax.f32 %v653_v54, 1.1754944e-38  ;;  %v687_v29 = vand.u32 4294967232, %v662_v12 }
 0x100   : > { %v1694_v56 = vpop.f32.mrf.mxu0 }
 0x101   : > { %v650_v63 = vmul.f32 2.0, %v1694_v56  ;;  %v655_v2 = vsub.f32 %v639_v58, %v647_v53  ;;  %v664_v13 = vmax.f32 %v656_v62, 1.1754944e-38  ;;  %v686_v21 = vand.u32 4294967232, %v661_v5 }
 0x102   : > { %v579_v0 = vpop.f32.mrf.mxu0  ;;  %v695_v41 = vor.u32 %v687_v29, %v671_v8 }
 0x103   : > { %v649_v3 = vmul.f32 2.0, %v579_v0  ;;  %v658_v6 = vsub.f32 %v642_v55, %v650_v63  ;;  %v663_v17 = vmax.f32 %v655_v2, 1.1754944e-38  ;;  %v689_v30 = vand.u32 4294967232, %v664_v13 }
 0x104   : > { %v1697_v7 = vpop.f32.mrf.mxu0  ;;  %v694_v37 = vor.u32 %v686_v21, %v670_v59 }
 0x105   : > { %v657_v9 = vsub.f32 %v641_v60, %v649_v3  ;;  %v652_v10 = vmul.f32 2.0, %v1697_v7  ;;  %v666_v14 = vmax.f32 %v658_v6, 1.1754944e-38  ;;  %v688_v33 = vand.u32 4294967232, %v663_v17 }
 0x106   : > { %v589_v16 = vpop.f32.mrf.mxu0  ;;  %v2151_v42 = vor.u32 %v689_v30, %v673_v22 }
 0x107   : > { %v665_v18 = vmax.f32 %v657_v9, 1.1754944e-38  ;;  %v660_v19 = vsub.f32 %v644_v4, %v652_v10  ;;  %v651_v20 = vmul.f32 2.0, %v589_v16  ;;  %v691_v25 = vand.u32 4294967232, %v666_v14 }
 0x108   : > { %v696_v43 = vor.u32 %v688_v33, %v672_v31 }
 0x109   : > { %v690_v26 = vand.u32 4294967232, %v665_v18  ;;  %v668_v27 = vmax.f32 %v660_v19, 1.1754944e-38  ;;  %v659_v28 = vsub.f32 %v643_v11, %v651_v20  ;;  %v2147_v38 = vor.u32 %v691_v25, %v675_v23 }
 0x10b   : > { %v2145_v34 = vor.u32 %v690_v26, %v674_v15  ;;  %v693_v35 = vand.u32 4294967232, %v668_v27  ;;  %v667_v36 = vmax.f32 %v659_v28, 1.1754944e-38  ;;  %v711_v46 = vmin.f32 %v695_v41, %v2147_v38 }
 0x10d   : > { %v2149_v39 = vor.u32 %v693_v35, %v677_v24  ;;  %v692_v40 = vand.u32 4294967232, %v667_v36  ;;  %v710_v44 = vmin.f32 %v694_v37, %v2145_v34 }
 0x10f   : > { %v2154_v45 = vor.u32 %v692_v40, %v676_v32  ;;  %v713_v47 = vmin.f32 %v2151_v42, %v2149_v39  ;;  %v714_v49 = vmin.f32 %v710_v44, %v711_v46 }
 0x111   : > { %v712_v48 = vmin.f32 %v696_v43, %v2154_v45 }
 0x113   : > { %v715_v50 = vmin.f32 %v712_v48, %v713_v47 }
 0x115   : > { %v716_v51 = vmin.f32 %v714_v49, %v715_v50 }
 0x117   : > { %v717_v52 = vrot.slane %v716_v51, 4 }
 0x119   : > { %v718_v53 = vmin.f32 %v716_v51, %v717_v52 }
 0x11b   : > { %v719_v54 = vrot.slane %v718_v53, 2 }
 0x11d   : > { %v720_v55 = vmin.f32 %v718_v53, %v719_v54 }
 0x11f   : > { %v721_v56 = vrot.slane %v720_v55, 1 }
 0x121   : > { %v2160_v57 = vmin.f32 %v720_v55, %v721_v56 }
 0x123   : > { %vm725_vm2 = vcmp.eq.f32.partialorder %v696_v43, %v2160_v57  ;;  %vm729_vm3 = vcmp.eq.f32.partialorder %v2154_v45, %v2160_v57  ;;  %v732_v58 = vand.u32 4294967232, %v2160_v57  ;;  %vm723_vm4 = vcmp.eq.f32.partialorder %v694_v37, %v2160_v57 }
 0x124   : > { %v2169_v59 = vsel %vm725_vm2, inf, %v696_v43  ;;  %v2175_v60 = vsel %vm729_vm3, inf, %v2154_v45  ;;  %vm724_vm5 = vcmp.eq.f32.partialorder %v695_v41, %v2160_v57  ;;  %vm726_vm6 = vcmp.eq.f32.partialorder %v2151_v42, %v2160_v57 }
 0x125   : > { %v734_v61 = vadd.f32 1e-08, %v732_v58  ;;  %v763_v62 = vmin.f32 %v2169_v59, %v2175_v60  ;;  %vm727_vm7 = vcmp.eq.f32.partialorder %v2145_v34, %v2160_v57  ;;  %vm728_vm8 = vcmp.eq.f32.partialorder %v2147_v38, %v2160_v57 }
 0x126   : > { %vm730_vm9 = vcmp.eq.f32.partialorder %v2149_v39, %v2160_v57  ;;  %v2190_v63 = vsel %vm723_vm4, inf, %v694_v37  ;;  %v754_v0 = vsel %vm724_vm5, inf, %v695_v41  ;;  %v2198_v1 = vsel %vm726_vm6, inf, %v2151_v42  ;;  %v856_v42 = vld [vmem:[%s2134_s24 + $0x8] sm:$0xff]  ;;  %v857_v57 = vld [vmem:[%s2134_s24 + $0x10] sm:$0xff] }
 0x127   : > { %1858 = vrcp.f32 %v734_v61  ;;  %v2204_v2 = vsel %vm727_vm7, inf, %v2145_v34  ;;  %v2210_v3 = vsel %vm728_vm8, inf, %v2147_v38  ;;  %v760_v4 = vsel %vm730_vm9, inf, %v2149_v39 }
 0x128   : > { %v761_v5 = vmin.f32 %v2190_v63, %v2204_v2  ;;  %v762_v6 = vmin.f32 %v754_v0, %v2210_v3  ;;  %v764_v7 = vmin.f32 %v2198_v1, %v760_v4 }
 0x12a   : > { %v765_v8 = vmin.f32 %v761_v5, %v762_v6  ;;  %v766_v9 = vmin.f32 %v763_v62, %v764_v7 }
 0x12c   : > { %v767_v10 = vmin.f32 %v765_v8, %v766_v9 }
 0x12e   : > { %v768_v11 = vrot.slane %v767_v10, 4 }
 0x130   : > { %v769_v12 = vmin.f32 %v767_v10, %v768_v11 }
 0x132   : > { %v770_v13 = vrot.slane %v769_v12, 2 }
 0x134   : > { %v2220_v14 = vpop.eup %1858  ;;  %v771_v15 = vmin.f32 %v769_v12, %v770_v13 }
 0x135   : > { %v738_v17 = vsel %vm725_vm2, %v2220_v14, 0.0  ;;  %v737_v18 = vsel %vm724_vm5, %v2220_v14, 0.0  ;;  %v736_v19 = vsel %vm723_vm4, %v2220_v14, 0.0  ;;  %v739_v34 = vsel %vm726_vm6, %v2220_v14, 0.0 }
 0x136   : > { %v772_v16 = vrot.slane %v771_v15, 1  ;;  %vm980_vm6 = vcmask 130048  }
 0x138   : > { %v2231_v20 = vmin.f32 %v771_v15, %v772_v16 }
 0x13a   : > { %vm774_vm10 = vcmp.eq.f32.partialorder %v2190_v63, %v2231_v20  ;;  %vm775_vm11 = vcmp.eq.f32.partialorder %v754_v0, %v2231_v20  ;;  %vm776_vm12 = vcmp.eq.f32.partialorder %v2169_v59, %v2231_v20  ;;  %vm777_vm13 = vcmp.eq.f32.partialorder %v2198_v1, %v2231_v20 }
 0x13b   : > { %vm778_vm14 = vcmp.eq.f32.partialorder %v2204_v2, %v2231_v20  ;;  %vm779_vm15 = vcmp.eq.f32.partialorder %v2210_v3, %v2231_v20  ;;  %vm780_vm0 = vcmp.eq.f32.partialorder %v2175_v60, %v2231_v20  ;;  %vm781_vm2 = vcmp.eq.f32.partialorder %v760_v4, %v2231_v20 }
 0x13c   : > { %v783_v21 = vand.u32 4294967232, %v2231_v20  ;;  %v804_v22 = vsel %vm774_vm10, inf, %v2190_v63  ;;  %v805_v23 = vsel %vm775_vm11, inf, %v754_v0  ;;  %v806_v24 = vsel %vm776_vm12, inf, %v2169_v59 }
 0x13d   : > { %v2262_v25 = vsel %vm777_vm13, inf, %v2198_v1  ;;  %v2268_v26 = vsel %vm778_vm14, inf, %v2204_v2  ;;  %v809_v27 = vsel %vm779_vm15, inf, %v2210_v3  ;;  %v810_v28 = vsel %vm780_vm0, inf, %v2175_v60 }
 0x13e   : > { %v785_v29 = vadd.f32 1e-08, %v783_v21  ;;  %v811_v30 = vsel %vm781_vm2, inf, %v760_v4  ;;  %v812_v31 = vmin.f32 %v804_v22, %v2268_v26  ;;  %v813_v32 = vmin.f32 %v805_v23, %v809_v27 }
 0x13f   : > { %v814_v33 = vmin.f32 %v806_v24, %v810_v28  ;;  %v815_v35 = vmin.f32 %v2262_v25, %v811_v30  ;;  %v743_v63 = vsel %vm730_vm9, %v2220_v14, 0.0  ;;  %v742_v4 = vsel %vm729_vm3, %v2220_v14, 0.0 }
 0x140   : > { %1860 = vrcp.f32 %v785_v29  ;;  %v816_v36 = vmin.f32 %v812_v31, %v813_v32  ;;  %v741_v60 = vsel %vm728_vm8, %v2220_v14, 0.0  ;;  %v964_v29 = vld [vmem:[%s2520_s4] sm:$0xff]  ;;  %v975_v31 = vld [vmem:[%s2521_s5 + $0x18] sm:$0xff] }
 0x141   : > { %v817_v37 = vmin.f32 %v814_v33, %v815_v35  ;;  %v976_v32 = vld [vmem:[%s2521_s5 + $0x20] sm:$0xff]  ;;  %v977_v33 = vld [vmem:[%s2521_s5 + $0x28] sm:$0xff]  ;;  %v978_v35 = vld [vmem:[%s2521_s5 + $0x30] sm:$0xff] }
 0x143   : > { %v818_v40 = vmin.f32 %v816_v36, %v817_v37  ;;  %v979_v36 = vld [vmem:[%s2521_s5 + $0x38] sm:$0xff]  ;;  %v1246_v37 = vld [vmem:[%s2522_s6 + $0x30] sm:$0xff] }
 0x145   : > { %v819_v41 = vrot.slane %v818_v40, 4 }
 0x147   : > { %v820_v43 = vmin.f32 %v818_v40, %v819_v41  ;;  %v1960_v40 = vmov 0   ;;  %v1245_v41 = vld [vmem:[%s2522_s6 + $0x28] sm:$0xff] }
 0x148   : > { %1857 = vset.pattern.permute.xlu1 %v1960_v40  ;;  %1856 = vset.pattern.permute.xlu0 %v1960_v40 }
 0x149   : > { %v821_v44 = vrot.slane %v820_v43, 2  ;;  %1280 = vperm.xlu1 %1857, %v1246_v37  }
 0x14b   : > { %v822_v46 = vmin.f32 %v820_v43, %v821_v44  ;;  %v1247_v43 = vld [vmem:[%s2522_s6 + $0x38] sm:$0xff]  ;;  %v1309_v44 = vld [vmem:[%s2524_s8 + $0x8] sm:$0xff] }
 0x14c   : > { %1285 = vperm.xlu0 %1856, %v1247_v43  }
 0x14d   : > { %v1861_v47 = vpop.eup %1860  ;;  %v823_v48 = vrot.slane %v822_v46, 1  ;;  %1275 = vperm.xlu1 %1857, %v1245_v41  }
 0x14e   : > { %v789_v50 = vsel %vm776_vm12, %v1861_v47, 0.0  ;;  %v788_v51 = vsel %vm775_vm11, %v1861_v47, 0.0  ;;  %v787_v56 = vsel %vm774_vm10, %v1861_v47, 0.0  ;;  %v803_v58 = vadd.f32 %v1861_v47, %v2220_v14 }
 0x14f   : > { %v824_v49 = vmin.f32 %v822_v46, %v823_v48  ;;  %v797_v53 = vadd.f32 %v789_v50, %v738_v17  ;;  %v796_v55 = vadd.f32 %v788_v51, %v737_v18  ;;  %v795_v61 = vadd.f32 %v787_v56, %v736_v19  ;;  %v1244_v46 = vld [vmem:[%s2522_s6 + $0x20] sm:$0xff]  ;;  %v1243_v48 = vld [vmem:[%s2522_s6 + $0x18] sm:$0xff]  ;;  %v1241_v50 = vld [vmem:[%s2522_s6 + $0x8] sm:$0xff] }
 0x150   : > { %v794_v62 = vsel %vm781_vm2, %v1861_v47, 0.0  ;;  %v793_v59 = vsel %vm780_vm0, %v1861_v47, 0.0  ;;  %v792_v0 = vsel %vm779_vm15, %v1861_v47, 0.0  ;;  %v791_v3 = vsel %vm778_vm14, %v1861_v47, 0.0  ;;  %1319 = vperm.xlu0 %1856, %v1309_v44   ;;  %v1240_v51 = vld [vmem:[%s2522_s6] sm:$0xff] }
 0x151   : > { %v834_v52 = vand.u32 4294967232, %v824_v49  ;;  %v802_v5 = vadd.f32 %v794_v62, %v743_v63  ;;  %vm832_vm4 = vcmp.eq.f32.partialorder %v811_v30, %v824_v49  ;;  %v801_v7 = vadd.f32 %v793_v59, %v742_v4  ;;  %v974_v30 = vld [vmem:[%s2521_s5 + $0x10] sm:$0xff]  ;;  %1270 = vperm.xlu1 %1857, %v1244_v46  }
 0x152   : > { %vm831_vm5 = vcmp.eq.f32.partialorder %v810_v28, %v824_v49  ;;  %v800_v39 = vadd.f32 %v792_v0, %v741_v60  ;;  %vm830_vm9 = vcmp.eq.f32.partialorder %v809_v27, %v824_v49  ;;  %vm829_vm10 = vcmp.eq.f32.partialorder %v2268_v26, %v824_v49  ;;  %v972_v27 = vld [vmem:[%s2521_s5] sm:$0xff]  ;;  %v973_v28 = vld [vmem:[%s2521_s5 + $0x8] sm:$0xff]  ;;  %v966_v4 = vld [vmem:[%s2520_s4 + $0x10] sm:$0xff] }
 0x153   : > { %v836_v54 = vadd.f32 1e-08, %v834_v52  ;;  %vm827_vm3 = vcmp.eq.f32.partialorder %v806_v24, %v824_v49  ;;  %vm826_vm11 = vcmp.eq.f32.partialorder %v805_v23, %v824_v49  ;;  %vm825_vm12 = vcmp.eq.f32.partialorder %v804_v22, %v824_v49  ;;  %1724 = vmatprep.mubr.msk.f32.mxu0 %vm980_vm6, %v972_v27  ;;  %v1308_v52 = vld [vmem:[%s2524_s8] sm:$0xff]  ;;  %v967_v60 = vld [vmem:[%s2520_s4 + $0x18] sm:$0xff] }
 0x154   : > { %v740_v17 = vsel %vm727_vm7, %v2220_v14, 0.0  ;;  %v790_v19 = vsel %vm777_vm13, %v1861_v47, 0.0  ;;  %vm828_vm8 = vcmp.eq.f32.partialorder %v2262_v25, %v824_v49  ;;  %v858_v14 = vld [vmem:[%s2134_s24 + $0x18] sm:$0xff]  ;;  %v962_v25 = vld [vmem:[%s2142_s29] sm:$0xff]  ;;  %vm1110_vm7 = vcmask 261120   ;;  %s1780_s29 = smul.u32 20, %s1946_s13 }
 0x155   : > { %1862 = vrcp.f32 %v836_v54  ;;  %v799_v23 = vadd.f32 %v791_v3, %v740_v17  ;;  %v798_v1 = vadd.f32 %v790_v19, %v739_v34  ;;  %1722 = vmatprep.subr.mxu0 %v962_v25  ;;  %v1311_v47 = vld [vmem:[%s2524_s8 + $0x18] sm:$0xff]  ;;  %1265 = vperm.xlu1 %1857, %v1243_v48   ;;  %v1242_v49 = vld [vmem:[%s2522_s6 + $0x10] sm:$0xff]  ;;  %v968_v3 = vld [vmem:[%s2520_s4 + $0x20] sm:$0xff]  ;;  %s1870_s24 = sshll.u32 %s1961_s22, 4  ;;  %s1871_s24 = int_to_ptr.vmem [resolvable:$false] %s1870_s24 }
 0x156   : > { %1723 = vmatpush3.msra.mxu0 %v962_v25  ;;  %1329 = vperm.xlu0 %1856, %v1311_v47   ;;  %s1449_s17 = sadd.s32 %s1942_s12, %s1780_s29  ;;  %s1872_s19 = scalar_lea.vmem %s1871_s24, 1024 }
 0x157   : > { %1725 = vmatmul.mubr.msk.f32.vlgmr.msra.gmra.mxu0 %vm980_vm6, %v973_v28  ;;  %s1624_s25 = sshll.u32 %s1449_s17, 7  ;;  %p1873_p6 = scmp.lt.s32.totalorder %s2458_s21, %s1871_s24 }
 0x158   : > { %1727 = vmatprep.mubr.msk.f32.mxu0 %vm980_vm6, %v974_v30  ;;  %s2463_s26 = scalar_lea.hbm %s2525_s9, %s1624_s25  ;;  %p1874_p7 = scmp.lt.s32.totalorder %s1872_s19, %s1866_s20 }
 0x159   : > { %1260 = vperm.xlu1 %1857, %v1242_v49  }
 0x15a   : > { %p1875_p10 = por %p1874_p7, %p1873_p6 }
 0x15b   : > { %1728 = vmatmul.mubr.msk.f32.gmra.mxu0 %vm980_vm6, %v975_v31 }
 0x15c   : > { %1730 = vmatprep.mubr.msk.f32.mxu0 %vm980_vm6, %v976_v32  ;;  %p1876_p11 = pnand %p1875_p10, %p1869_p5 }
 0x15d   : > { %1255 = vperm.xlu1 %1857, %v1241_v50  }
 0x15f   : > { %1731 = vmatmul.mubr.msk.f32.gmra.mxu0 %vm980_vm6, %v977_v33 }
 0x160   : > { %1733 = vmatprep.mubr.msk.f32.mxu0 %vm980_vm6, %v978_v35 }
 0x161   : > { %1250 = vperm.xlu1 %1857, %v1240_v51  }
 0x162   : > { %v1863_v6 = vpop.eup %1862 }
 0x163   : > { %v845_v8 = vsel %vm832_vm4, %v1863_v6, 0.0  ;;  %v844_v9 = vsel %vm831_vm5, %v1863_v6, 0.0  ;;  %v843_v38 = vsel %vm830_vm9, %v1863_v6, 0.0  ;;  %v840_v10 = vsel %vm827_vm3, %v1863_v6, 0.0  ;;  %1734 = vmatmul.mubr.msk.f32.gmra.mxu0 %vm980_vm6, %v979_v36 }
 0x164   : > { %v853_v45 = vadd.f32 %v845_v8, %v802_v5  ;;  %v839_v11 = vsel %vm826_vm11, %v1863_v6, 0.0  ;;  %v838_v12 = vsel %vm825_vm12, %v1863_v6, 0.0  ;;  %v852_v2 = vadd.f32 %v844_v9, %v801_v7  ;;  %v965_v5 = vld [vmem:[%s2520_s4 + $0x8] sm:$0xff]  ;;  %v970_v7 = vld [vmem:[%s2520_s4 + $0x30] sm:$0xff]  ;;  %v1304_v8 = vld [vmem:[%s2523_s7] sm:$0xff] }
 0x165   : > { %v848_v13 = vadd.f32 %v840_v10, %v797_v53  ;;  %v847_v15 = vadd.f32 %v839_v11, %v796_v55  ;;  %v846_v16 = vadd.f32 %v838_v12, %v795_v61  ;;  %v842_v18 = vsel %vm829_vm10, %v1863_v6, 0.0  ;;  %1314 = vperm.xlu1 %1857, %v1308_v52   ;;  %v1310_v53 = vld [vmem:[%s2524_s8 + $0x10] sm:$0xff]  ;;  %1772 = vmatprep.mubr.msk.f32.mxu0 %vm859_vm1, %v1304_v8 }
 0x166   : > { %1698 = vmatprep.subr.mxu1 %v853_v45  ;;  %v2324_v21 = vadd.f32 %v1863_v6, %v803_v58  ;;  %v851_v22 = vadd.f32 %v843_v38, %v800_v39  ;;  %v841_v24 = vsel %vm828_vm8, %v1863_v6, 0.0  ;;  %v850_v26 = vadd.f32 %v842_v18, %v799_v23  ;;  %v969_v6 = vld [vmem:[%s2520_s4 + $0x28] sm:$0xff]  ;;  %v971_v39 = vld [vmem:[%s2520_s4 + $0x38] sm:$0xff] }
 0x167   : > { %1699 = vmatpush3.msra.mxu1 %v853_v45  ;;  %v849_v20 = vadd.f32 %v841_v24, %v798_v1 }
 0x168   : > { %1700 = vmatprep.subr.mxu1 %v852_v2  ;;  %1864 = vrcp.f32 %v2324_v21 }
 0x169   : > { %1701 = vmatpush3.msra.mxu1 %v852_v2  ;;  %1324 = vperm.xlu1 %1857, %v1310_v53  }
 0x16a   : > { %1702 = vmatprep.subr.mxu1 %v851_v22 }
 0x16b   : > { %1703 = vmatpush3.msra.mxu1 %v851_v22 }
 0x16c   : > { %1704 = vmatprep.subr.mxu1 %v850_v26 }
 0x16d   : > { %1705 = vmatpush3.msra.mxu1 %v850_v26 }
 0x16e   : > { %1706 = vmatprep.subr.mxu1 %v849_v20 }
 0x16f   : > { %1707 = vmatpush3.msra.mxu1 %v849_v20 }
 0x170   : > { %1708 = vmatprep.subr.mxu1 %v848_v13 }
 0x171   : > { %1709 = vmatpush3.msra.mxu1 %v848_v13 }
 0x172   : > { %1710 = vmatprep.subr.mxu1 %v847_v15 }
 0x173   : > { %1711 = vmatpush3.msra.mxu1 %v847_v15 }
 0x174   : > { %1712 = vmatprep.subr.mxu1 %v846_v16 }
 0x175   : > { %1713 = vmatpush3.msra.mxu1 %v846_v16  ;;  %v1865_v56 = vpop.eup %1864 }
 0x176   : > { %1715 = vmatmul.mubr.msk.f32.vlgmr.msra.gmra.mxu1 %vm859_vm1, %v856_v42 }
 0x177   : > { %1717 = vmatprep.mubr.msk.f32.mxu1 %vm859_vm1, %v857_v57 }
 0x17a   : > { %1718 = vmatmul.mubr.msk.f32.gmra.mxu1 %vm859_vm1, %v858_v14 }
 0x17b   : > { %1744 = vmatprep.mubr.msk.f32.mxu1 %vm1110_vm7, %v964_v29 }
 0x1c4   : > { %v1281_v45 = vpop.permute.xlu1 %1280 }
 0x1c7   : > { %v1286_v1 = vpop.permute.xlu0 %1285 }
 0x1c8   : > { %v1276_v11 = vpop.permute.xlu1 %1275 }
 0x1cc   : > { %v1271_v13 = vpop.permute.xlu1 %1270 }
 0x1d0   : > { %v1266_v21 = vpop.permute.xlu1 %1265 }
 0x1d4   : > { %v1261_v26 = vpop.permute.xlu1 %1260 }
 0x1d8   : > { %v1256_v37 = vpop.permute.xlu1 %1255 }
 0x1dc   : > { %v1251_v50 = vpop.permute.xlu1 %1250 }
 0x217   : > { %v1726_v9 = vpop.f32.mrf.mxu0 }
 0x219   : > { %v1071_v38 = vpop.f32.mrf.mxu0 }
 0x21b   : > { %v1729_v10 = vpop.f32.mrf.mxu0 }
 0x21d   : > { %v1081_v12 = vpop.f32.mrf.mxu0 }
 0x21f   : > { %v1732_v16 = vpop.f32.mrf.mxu0 }
 0x221   : > { %v1091_v19 = vpop.f32.mrf.mxu0 }
 0x223   : > { %v1735_v23 = vpop.f32.mrf.mxu0 }
 0x225   : > { %v1101_v57 = vpop.f32.mrf.mxu0 }
 0x236   : > { %v1716_v54 = vpop.f32.mrf.mxu1 }
 0x237   : > { %v959_v0 = vmul.f32 %v1865_v56, %v1716_v54 }
 0x238   : > { %v938_v55 = vpop.f32.mrf.mxu1 }
 0x239   : > { %v958_v63 = vmul.f32 %v1865_v56, %v938_v55  ;;  %v1305_v55 = vld [vmem:[%s2523_s7 + $0x8] sm:$0xff] }
 0x23a   : > { %v1719_v58 = vpop.f32.mrf.mxu1 }
 0x23b   : > { %v961_v61 = vmul.f32 %v1865_v56, %v1719_v58  ;;  %v1307_v58 = vld [vmem:[%s2523_s7 + $0x18] sm:$0xff] }
 0x23c   : > { %v948_v62 = vpop.f32.mrf.mxu1 }
 0x23d   : > { %v960_v59 = vmul.f32 %v1865_v56, %v948_v62  ;;  %1736 = vmatprep.subr.mxu1 %v961_v61  ;;  %v1306_v56 = vld [vmem:[%s2523_s7 + $0x10] sm:$0xff]  ;;  %v1315_v62 = vpop.permute.xlu1 %1314 }
 0x23e   : > { %1737 = vmatpush3.msra.mxu1 %v961_v61  ;;  %v1320_v61 = vpop.permute.xlu0 %1319 }
 0x23f   : > { %1738 = vmatprep.subr.mxu1 %v960_v59 }
 0x240   : > { %1739 = vmatpush3.msra.mxu1 %v960_v59 }
 0x241   : > { %1740 = vmatprep.subr.mxu1 %v959_v0 }
 0x242   : > { %1741 = vmatpush3.msra.mxu1 %v959_v0 }
 0x243   : > { %1742 = vmatprep.subr.mxu1 %v958_v63 }
 0x244   : > { %1743 = vmatpush3.msra.mxu1 %v958_v63 }
 0x245   : > { %1745 = vmatmul.mubr.msk.f32.vlgmr.msra.gmra.mxu1 %vm1110_vm7, %v965_v5 }
 0x246   : > { %1747 = vmatprep.mubr.msk.f32.mxu1 %vm1110_vm7, %v966_v4 }
 0x249   : > { %1748 = vmatmul.mubr.msk.f32.gmra.mxu1 %vm1110_vm7, %v967_v60  ;;  %v1330_v60 = vpop.permute.xlu0 %1329 }
 0x24a   : > { %1750 = vmatprep.mubr.msk.f32.mxu1 %vm1110_vm7, %v968_v3 }
 0x24d   : > { %1751 = vmatmul.mubr.msk.f32.gmra.mxu1 %vm1110_vm7, %v969_v6 }
 0x24e   : > { %1753 = vmatprep.mubr.msk.f32.mxu1 %vm1110_vm7, %v970_v7 }
 0x251   : > { %1754 = vmatmul.mubr.msk.f32.gmra.mxu1 %vm1110_vm7, %v971_v39  ;;  %v1325_v39 = vpop.permute.xlu1 %1324 }
 0x305   : > { %v1746_v2 = vpop.f32.mrf.mxu1 }
 0x306   : > { %v1207_v40 = vadd.f32 %v1746_v2, %v1726_v9 }
 0x307   : > { %v1201_v15 = vpop.f32.mrf.mxu1 }
 0x308   : > { %v1202_v44 = vadd.f32 %v1201_v15, %v1071_v38  ;;  %v1289_v48 = vadd.f32 %v1256_v37, %v1207_v40 }
 0x309   : > { %v1749_v17 = vpop.f32.mrf.mxu1 }
 0x30a   : > { %v1217_v29 = vadd.f32 %v1749_v17, %v1729_v10  ;;  %v1288_v51 = vadd.f32 %v1251_v50, %v1202_v44  ;;  %v1297_v53 = vmax.f32 %v1289_v48, 0.0 }
 0x30b   : > { %v1211_v18 = vpop.f32.mrf.mxu1 }
 0x30c   : > { %v1212_v33 = vadd.f32 %v1211_v18, %v1081_v12  ;;  %v1291_v41 = vadd.f32 %v1266_v21, %v1217_v29  ;;  %v1296_v54 = vmax.f32 %v1288_v51, 0.0 }
 0x30d   : > { %v1752_v22 = vpop.f32.mrf.mxu1 }
 0x30e   : > { %v1227_v20 = vadd.f32 %v1752_v22, %v1732_v16  ;;  %v1290_v46 = vadd.f32 %v1261_v26, %v1212_v33  ;;  %v1299_v49 = vmax.f32 %v1291_v41, 0.0 }
 0x30f   : > { %v1221_v34 = vpop.f32.mrf.mxu1 }
 0x310   : > { %v1222_v25 = vadd.f32 %v1221_v34, %v1091_v19  ;;  %v1293_v30 = vadd.f32 %v1276_v11, %v1227_v20  ;;  %v1298_v52 = vmax.f32 %v1290_v46, 0.0 }
 0x311   : > { %v1755_v24 = vpop.f32.mrf.mxu1 }
 0x312   : > { %v1237_v42 = vadd.f32 %v1755_v24, %v1735_v23  ;;  %v1292_v35 = vadd.f32 %v1271_v13, %v1222_v25  ;;  %v1301_v43 = vmax.f32 %v1293_v30, 0.0 }
 0x313   : > { %v1231_v14 = vpop.f32.mrf.mxu1 }
 0x314   : > { %v1295_v27 = vadd.f32 %v1286_v1, %v1237_v42  ;;  %v1232_v28 = vadd.f32 %v1231_v14, %v1101_v57  ;;  %v1300_v47 = vmax.f32 %v1292_v35, 0.0 }
 0x316   : > { %v1303_v31 = vmax.f32 %v1295_v27, 0.0  ;;  %v1294_v32 = vadd.f32 %v1281_v45, %v1232_v28 }
 0x318   : > { %v1302_v36 = vmax.f32 %v1294_v32, 0.0  ;;  %1756 = vmatprep.subr.mxu0 %v1303_v31 }
 0x319   : > { %1757 = vmatpush3.msra.mxu0 %v1303_v31 }
 0x31a   : > { %1758 = vmatprep.subr.mxu0 %v1302_v36 }
 0x31b   : > { %1759 = vmatpush3.msra.mxu0 %v1302_v36 }
 0x31c   : > { %1760 = vmatprep.subr.mxu0 %v1301_v43 }
 0x31d   : > { %1761 = vmatpush3.msra.mxu0 %v1301_v43 }
 0x31e   : > { %1762 = vmatprep.subr.mxu0 %v1300_v47 }
 0x31f   : > { %1763 = vmatpush3.msra.mxu0 %v1300_v47 }
 0x320   : > { %1764 = vmatprep.subr.mxu0 %v1299_v49 }
 0x321   : > { %1765 = vmatpush3.msra.mxu0 %v1299_v49 }
 0x322   : > { %1766 = vmatprep.subr.mxu0 %v1298_v52 }
 0x323   : > { %1767 = vmatpush3.msra.mxu0 %v1298_v52 }
 0x324   : > { %1768 = vmatprep.subr.mxu0 %v1297_v53 }
 0x325   : > { %1769 = vmatpush3.msra.mxu0 %v1297_v53 }
 0x326   : > { %1770 = vmatprep.subr.mxu0 %v1296_v54 }
 0x327   : > { %1771 = vmatpush3.msra.mxu0 %v1296_v54 }
 0x328   : > { %1773 = vmatmul.mubr.msk.f32.vlgmr.msra.gmra.mxu0 %vm859_vm1, %v1305_v55 }
 0x329   : > { %1775 = vmatprep.mubr.msk.f32.mxu0 %vm859_vm1, %v1306_v56 }
 0x32c   : > { %1776 = vmatmul.mubr.msk.f32.gmra.mxu0 %vm859_vm1, %v1307_v58 }
 0x3e8   : > { %v1774_v59 = vpop.f32.mrf.mxu0 }
 0x3e9   : > { %v1416_v0 = vadd.f32 %v1774_v59, %v1320_v61 }
 0x3ea   : > { %v1410_v63 = vpop.f32.mrf.mxu0 }
 0x3eb   : > { %v1430_v5 = vmax.f32 %v1416_v0, 0.0  ;;  %v1411_v4 = vadd.f32 %v1410_v63, %v1315_v62 }
 0x3ec   : > { %v1777_v3 = vpop.f32.mrf.mxu0 }
 0x3ed   : > { %1434 = vst [vmem:[%s440_s18 + $0x8] sm:$0xff] %v1430_v5  ;;  %v1429_v6 = vmax.f32 %v1411_v4, 0.0  ;;  %v1426_v7 = vadd.f32 %v1777_v3, %v1330_v60 }
 0x3ee   : > { %v1420_v8 = vpop.f32.mrf.mxu0 }
 0x3ef   : > { %1433 = vst [vmem:[%s440_s18] sm:$0xff] %v1429_v6  ;;  %v1432_v9 = vmax.f32 %v1426_v7, 0.0  ;;  %v1421_v45 = vadd.f32 %v1420_v8, %v1325_v39 }
 0x3f1   : > { %1436 = vst [vmem:[%s440_s18 + $0x18] sm:$0xff] %v1432_v9  ;;  %v1431_v38 = vmax.f32 %v1421_v45, 0.0 }
 0x3f3   : > { %1435 = vst [vmem:[%s440_s18 + $0x10] sm:$0xff] %v1431_v38 }
 0x3f4   : > { %1879 = shalt.err (!%p1876_p11)
}
 0x3f5   : > { %s1880_s29 = scalar_lea.hbm %s2463_s26, 512  ;;  %s1884_s25 = scalar_lea.hbm %s2525_s9, 5120 }
 0x3f6   : > { %p1881_p12 = scmp.ne.s32.totalorder %s2463_s26, %s1880_s29  ;;  %p1885_p1 = scmp.lt.s32.totalorder %s2463_s26, %s2525_s9 }
 0x3f7   : > { %p1886_p2 = scmp.lt.s32.totalorder %s1884_s25, %s1880_s29 }
 0x3f8   : > { %p1882_p13 = pnand %p1881_p12, %p2075_p8 }
 0x3f9   : > { %p1887_p3 = por %p1886_p2, %p1885_p1 }
 0x3fa   : > { %p1883_p0 = pneg %p1882_p13 }
 0x3fc   : > { %p1888_p4 = pnand %p1887_p3, %p1883_p0 }
 0x3fe   : > { %1891 = shalt.err (!%p1888_p4)
}
 0x3ff   : > { %s1962_s20 = smov 128   ;;  %s1963_s22 = smov 640  }
 0x400   : > { %s1964_s24 = smov 8  }
 0x401   : > { %1781 = dma.vmem_to_hbm [thread:$0]  (%p2075_p8), %s2458_s21, 512, %s2463_s26, %s1438_s3, %s1962_s20, %s1963_s22, %s1964_s24  }
 0x402 PF: > { %p1787_p5 = scmp.ge.s32.totalorder %s1958_s16, 2  ;;  %s1467_s17 = sand.u32 1, %s1930_s30  }
 0x403   : > { %s1468_s29 = scalar_lea.sflag [#allocation4], %s1467_s17 }
 0x404   : > { %p1784_p6 = pnand %p1787_p5, %p2079_p9 }
 0x406   : > { %p1785_p7 = pneg %p1784_p6 }
 0x408   : > { %1925 = dma.done.wait (%p1785_p7), %s1468_s29, 512  }
 0x409   : > { %1927 = vsyncadd (%p1785_p7), %s1468_s29, 4294966784  ;;  %s22_s16 = sadd.s32 1, %s1958_s16   ;;  %s2538_s23 = sld [smem:[#allocation6_spill]] }
 0x40a   : > { %p19_p10 = scmp.ge.s32.totalorder %s22_s16, 12   ;;  %s2539_s27 = sld [smem:[#allocation7_spill]] }
 0x40b   : > { %s2540_s30 = smov %s1934_s10  ;;  %s2541_s10 = smov %s1938_s11 }
 0x40c   : > { %s2542_s11 = smov %s2087_s28  ;;  %s2543_s12 = smov %s1950_s14 }
 0x40d   : > { %s2544_s13 = smov %s1954_s15  ;;  %21 = sbr.rel (!%p19_p10) target bundleno = 7 (0x7), region = 143 }
 0x40f   : > { %s2545_s14 = smov %s2538_s23 }
 0x410   : > { %s2546_s15 = smov %s2539_s27 }
 0x412   :  { %1473 = vsyncpa [#allocation4], 1 }
 0x413   :  { %1475 = vsyncpa [#allocation4 + $0x1], 1 }

</bundles_post_ra>
